<compile_context>
chip_gen: v7x
topology: tpu7x:2x2x1
jax: 0.10.0
libtpu: 0.0.40
codegen_flags: <defaults>
</compile_context>

<pallas_src>
import jax
import jax.numpy as jnp
import numpy as np
from jax.experimental import pallas as pl
from jax.experimental.pallas import tpu as pltpu


# ---------------------------------------------------------------------------
# Kernels
# ---------------------------------------------------------------------------
def _softmax_aggregate(x, scores, o_ref):
    """scores: (T, tn, 1) f32, x: (T, tn, D) f32 -> o_ref[0]: (tn, D).

    keepdims form keeps `tn` on the sublane axis throughout: the T-axis
    max/sum are cheap cross-vreg VPU reductions and the p*x broadcast is a
    lane splat -- no lane<->sublane relayouts.
    """
    m = jnp.max(scores, axis=0, keepdims=True)            # (1, tn, 1)
    e = jnp.exp(scores - m)                                # (T, tn, 1)
    p = e / jnp.sum(e, axis=0, keepdims=True)              # exact division
    o_ref[0] = jnp.sum(p * x, axis=0).astype(o_ref.dtype)  # (tn, D)


def _attn_kernel_mxu(b_ref, x_ref, w_ref, o_ref):
    # b_ref: (1,) f32 SMEM | x_ref: (1, T, tn, D) | w_ref: (D, 1) f32
    # o_ref: (1, tn, D)
    x = x_ref[0].astype(jnp.float32)                       # (T, tn, D)
    T, tn, D = x.shape
    # Score dot-product on the (otherwise idle) MXU; tn % 8 == 0 so the
    # reshape is tile-aligned (free view).
    scores = jnp.dot(
        x.reshape(T * tn, D), w_ref[...],
        preferred_element_type=jnp.float32,
        precision=jax.lax.Precision.HIGHEST,
    ).reshape(T, tn, 1) + b_ref[0]                         # (T, tn, 1)
    _softmax_aggregate(x, scores, o_ref)


def _attn_kernel_vpu(b_ref, x_ref, w_ref, o_ref):
    # Fallback when tn is not a multiple of 8 (tiny node dims).
    # b_ref: (1,) f32 SMEM | x_ref: (1, T, tn, D) | w_ref: (1, D) f32
    x = x_ref[0].astype(jnp.float32)                       # (T, tn, D)
    w = w_ref[...]                                         # (1, D) broadcasts
    scores = jnp.sum(x * w, axis=-1, keepdims=True) + b_ref[0]   # (T, tn, 1)
    _softmax_aggregate(x, scores, o_ref)


# ---------------------------------------------------------------------------
# Tiling / VMEM sizing
# ---------------------------------------------------------------------------
def _round_up(x, m):
    return ((x + m - 1) // m) * m


def _vmem_limit_bytes():
    """Per-generation scoped-VMEM limit: 96 MiB on the 128 MiB parts
    (v5e/v6e), ~48 MiB on v7x's 64 MiB physical VMEM."""
    cap = 64 << 20
    try:
        info = pltpu.get_tpu_info()
        cap = int(getattr(info, "vmem_capacity_bytes", cap)) or cap
    except Exception:
        pass
    return int(min(96 << 20, cap * 3 // 4))


def _pick_tn(N, T, D, in_itemsize, out_itemsize, vmem_limit_bytes):
    """Largest node chunk (multiple of 8, or the full N) whose *padded*
    footprint fits the scoped-VMEM budget: 2 input buffers + ~2 input-sized
    f32 intermediates + 2 output buffers, with the per-buffer input block
    capped at ~12 MiB (HBM-roofline returns flatten beyond that)."""
    d_pad = _round_up(D, 128)                      # lane padding (D<128 -> 128)
    per_node_in = T * d_pad * in_itemsize          # padded bytes per node col

    reserved = 1 << 20                             # weight/bias/misc headroom
    budget = max(vmem_limit_bytes - reserved, 1 << 20)
    target_in = min(budget // 4, 12 << 20)         # per-buffer input block

    cap_nodes = max(8, (target_in // per_node_in) // 8 * 8)
    if N <= cap_nodes:
        return N                                   # full dim block: always legal

    def fits(tn):
        tn_pad = _round_up(tn, 8)
        in_b = T * tn_pad * d_pad * in_itemsize
        out_b = tn_pad * d_pad * out_itemsize
        return 2 * (2 * in_b + out_b) + reserved <= vmem_limit_bytes

    tn = int(cap_nodes)
    while tn > 8 and not fits(tn):
        tn -= 8
    return tn


# ---------------------------------------------------------------------------
# Wrapper
# ---------------------------------------------------------------------------
def temporal_attention_aggregate(embeddings, weight, bias, *, node_chunk=None):
    """embeddings: [B, T, N, D] (f32 or bf16); weight: [1, D]; bias: [1]
    -> [B, N, D] in embeddings.dtype.  The PyTorch permute/flatten is fused
    into the BlockSpec index_map (grid = (batch, node-chunks))."""
    B, T, N, D = embeddings.shape
    out_dtype = embeddings.dtype
    in_item = jnp.dtype(embeddings.dtype).itemsize
    out_item = jnp.dtype(out_dtype).itemsize

    weight = weight.astype(jnp.float32)
    bias = bias.astype(jnp.float32)

    vmem_limit = _vmem_limit_bytes()
    if node_chunk is None:
        tn = _pick_tn(N, T, D, in_item, out_item, vmem_limit)
    else:
        tn = min(int(node_chunk), N)
    n_blocks = pl.cdiv(N, tn)          # ragged last block: padded in / masked out

    use_mxu = (tn % 8 == 0)
    if use_mxu:
        kernel = _attn_kernel_mxu
        w_arg = weight.reshape(D, 1)
        w_spec = pl.BlockSpec((D, 1), lambda b, n: (0, 0))
    else:
        kernel = _attn_kernel_vpu
        w_arg = weight.reshape(1, D)
        w_spec = pl.BlockSpec((1, D), lambda b, n: (0, 0))

    cost = pl.CostEstimate(
        flops=4 * B * N * T * D,                       # scores + weighted sum
        transcendentals=B * N * T,                     # exp
        bytes_accessed=B * T * N * D * in_item + B * N * D * out_item + D * 4 + 4,
    )

    return pl.pallas_call(
        kernel,
        out_shape=jax.ShapeDtypeStruct((B, N, D), out_dtype),
        grid_spec=pltpu.PrefetchScalarGridSpec(
            num_scalar_prefetch=0,
            grid=(B, n_blocks),
            in_specs=[
                pl.BlockSpec(memory_space=pltpu.MemorySpace.SMEM),          # bias
                pl.BlockSpec((1, T, tn, D), lambda b, n: (b, 0, n, 0)),     # x
                w_spec,                                                      # weight
            ],
            out_specs=pl.BlockSpec((1, tn, D), lambda b, n: (b, n, 0)),
        ),
        compiler_params=pltpu.CompilerParams(
            dimension_semantics=("parallel", "parallel"),
            vmem_limit_bytes=vmem_limit,
        ),
        cost_estimate=cost,
    )(bias, embeddings, w_arg)


# ---------------------------------------------------------------------------
# Reference + test
# ---------------------------------------------------------------------------
def _reference_np(embeddings, weight, bias):
    x = np.transpose(embeddings.astype(np.float64), (0, 2, 1, 3))   # (B,N,T,D)
    w = weight.astype(np.float64)[0]                                 # (D,)
    scores = x @ w + float(bias[0])                                  # (B,N,T)
    scores = scores - scores.max(axis=-1, keepdims=True)
    p = np.exp(scores)
    p = p / p.sum(axis=-1, keepdims=True)
    return np.einsum("bnt,bntd->bnd", p, x)                          # (B,N,D)


if __name__ == "__main__":
    B, T, N, D = 2, 8, 16, 32
    key = jax.random.PRNGKey(0)
    k1, k2, k3 = jax.random.split(key, 3)

    embeddings = jax.random.normal(k1, (B, T, N, D), dtype=jnp.float32)
    # deterministic init mimicking nn.Linear(embed_dim, 1): U(-1/sqrt(D), 1/sqrt(D))
    bound = 1.0 / np.sqrt(D)
    weight = jax.random.uniform(k2, (1, D), minval=-bound, maxval=bound,
                                dtype=jnp.float32)
    bias = jax.random.uniform(k3, (1,), minval=-bound, maxval=bound,
                              dtype=jnp.float32)

    # Main path (single full-N block, MXU score dot).
    out = jax.block_until_ready(
        temporal_attention_aggregate(embeddings, weight, bias))
    ref = _reference_np(np.asarray(embeddings), np.asarray(weight),
                        np.asarray(bias))
    np.testing.assert_allclose(np.asarray(out), ref.astype(np.float32),
                               rtol=1e-4, atol=1e-4)

    # Ragged-N / multi-block path: forced node chunk of 8 with N=12 exercises
    # the padded edge block and the masked partial output store.
    B2, T2, N2, D2 = 2, 4, 12, 32
    e2 = jax.random.normal(k1, (B2, T2, N2, D2), dtype=jnp.float32)
    out2 = jax.block_until_ready(
        temporal_attention_aggregate(e2, weight, bias, node_chunk=8))
    ref2 = _reference_np(np.asarray(e2), np.asarray(weight), np.asarray(bias))
    np.testing.assert_allclose(np.asarray(out2), ref2.astype(np.float32),
                               rtol=1e-4, atol=1e-4)

    print("KERNEL_OK")
</pallas_src>

<mosaic_0001>
module attributes {stable_mosaic.version = 11 : i64} {
  func.func @_attn_kernel_mxu(%arg0: i32, %arg1: i32, %arg2: memref<1xf32, #tpu.memory_space<smem>>, %arg3: memref<1x8x16x32xf32, #tpu.memory_space<vmem>>, %arg4: memref<32x1xf32, #tpu.memory_space<vmem>>, %arg5: memref<1x16x32xf32, #tpu.memory_space<vmem>>) attributes {dimension_semantics = [#tpu.dimension_semantics<parallel>, #tpu.dimension_semantics<parallel>], iteration_bounds = array<i64: 2, 1>, scalar_prefetch = 0 : i64, scratch_operands = 0 : i64, tpu.core_type = #tpu.core_type<tc>, window_params = [{transform_indices = @transform_0, window_bounds = array<i64: 1>}, {transform_indices = @transform_1, window_bounds = array<i64: 1, 8, 16, 32>}, {pipeline_mode = #tpu.pipeline_mode<synchronous>, transform_indices = @transform_2, window_bounds = array<i64: 32, 1>}, {transform_indices = @transform_3, window_bounds = array<i64: 1, 16, 32>}]} {
    %c0 = arith.constant 0 : index
    %c0_0 = arith.constant 0 : index
    %c0_1 = arith.constant 0 : index
    %c0_2 = arith.constant 0 : index
    %0 = vector.load %arg3[%c0, %c0_0, %c0_1, %c0_2] : memref<1x8x16x32xf32, #tpu.memory_space<vmem>>, vector<1x8x16x32xf32>
    %1 = vector.shape_cast %0 : vector<1x8x16x32xf32> to vector<8x16x32xf32>
    %2 = vector.shape_cast %1 : vector<8x16x32xf32> to vector<128x32xf32>
    %c0_3 = arith.constant 0 : index
    %c0_4 = arith.constant 0 : index
    %3 = vector.load %arg4[%c0_3, %c0_4] : memref<32x1xf32, #tpu.memory_space<vmem>>, vector<32x1xf32>
    %cst = arith.constant dense<0.000000e+00> : vector<128x1xf32>
    %4 = tpu.matmul %2, %3, %cst {dimension_numbers = #tpu.dot_dimension_numbers<[1], [0], [0], [1], [0, 0, 1, 1], [], []>, precision = #tpu.contract_precision<fp32>} : vector<128x32xf32>, vector<32x1xf32>, vector<128x1xf32> -> vector<128x1xf32>
    %5 = vector.shape_cast %4 : vector<128x1xf32> to vector<8x16x1xf32>
    %c0_5 = arith.constant 0 : index
    %6 = memref.load %arg2[%c0_5] : memref<1xf32, #tpu.memory_space<smem>>
    %7 = vector.broadcast %6 : f32 to vector<8x16x1xf32>
    %8 = arith.addf %5, %7 : vector<8x16x1xf32>
    %cst_6 = arith.constant dense<0xFF800000> : vector<16x1xf32>
    %9 = vector.multi_reduction <maximumf>, %8, %cst_6 [0] : vector<8x16x1xf32> to vector<16x1xf32>
    %10 = vector.shape_cast %9 : vector<16x1xf32> to vector<1x16x1xf32>
    %11 = vector.broadcast %10 : vector<1x16x1xf32> to vector<8x16x1xf32>
    %12 = arith.subf %8, %11 : vector<8x16x1xf32>
    %13 = math.exp %12 : vector<8x16x1xf32>
    %cst_7 = arith.constant dense<0.000000e+00> : vector<16x1xf32>
    %14 = vector.multi_reduction <add>, %13, %cst_7 [0] : vector<8x16x1xf32> to vector<16x1xf32>
    %15 = vector.shape_cast %14 : vector<16x1xf32> to vector<1x16x1xf32>
    %16 = vector.broadcast %15 : vector<1x16x1xf32> to vector<8x16x1xf32>
    %17 = arith.divf %13, %16 : vector<8x16x1xf32>
    %18 = vector.broadcast %17 : vector<8x16x1xf32> to vector<8x16x32xf32>
    %19 = arith.mulf %18, %1 : vector<8x16x32xf32>
    %cst_8 = arith.constant dense<0.000000e+00> : vector<16x32xf32>
    %20 = vector.multi_reduction <add>, %19, %cst_8 [0] : vector<8x16x32xf32> to vector<16x32xf32>
    %c0_9 = arith.constant 0 : index
    %c0_10 = arith.constant 0 : index
    %c0_11 = arith.constant 0 : index
    %21 = vector.load %arg5[%c0_9, %c0_10, %c0_11] : memref<1x16x32xf32, #tpu.memory_space<vmem>>, vector<1x16x32xf32>
    %22 = vector.shape_cast %21 : vector<1x16x32xf32> to vector<16x32xf32>
    %23 = vector.shape_cast %20 : vector<16x32xf32> to vector<1x16x32xf32>
    tpu.vector_store %arg5[%c0_9, %c0_10, %c0_11], %23 {strides = array<i32>} : memref<1x16x32xf32, #tpu.memory_space<vmem>>, vector<1x16x32xf32>,
    return
  }
  func.func @transform_0(%arg0: i32, %arg1: i32) -> i32 {
    %c0_i32 = arith.constant 0 : i32
    %c0_i32_0 = arith.constant 0 : i32
    return %c0_i32 : i32
  }
  func.func @transform_1(%arg0: i32, %arg1: i32) -> (i32, i32, i32, i32) {
    %c0_i32 = arith.constant 0 : i32
    %c0_i32_0 = arith.constant 0 : i32
    %c0_i32_1 = arith.constant 0 : i32
    return %arg0, %c0_i32, %arg1, %c0_i32_0 : i32, i32, i32, i32
  }
  func.func @transform_2(%arg0: i32, %arg1: i32) -> (i32, i32) {
    %c0_i32 = arith.constant 0 : i32
    %c0_i32_0 = arith.constant 0 : i32
    %c0_i32_1 = arith.constant 0 : i32
    return %c0_i32, %c0_i32_0 : i32, i32
  }
  func.func @transform_3(%arg0: i32, %arg1: i32) -> (i32, i32, i32) {
    %c0_i32 = arith.constant 0 : i32
    %c0_i32_0 = arith.constant 0 : i32
    return %arg0, %arg1, %c0_i32 : i32, i32, i32
  }
}

</mosaic_0001>

<bundles_post_ra>
// kernel: tpu_custom_call.1
= control target key start
LH: loop header
LB: loop body
LE: loop exit
PB: predicated region body
PF: predicated region fallthrough
CT: control target
= control target key end

     0   :  { %s3117_s0 = inlined_call_operand.<no memory space> [shape: f32[1], index: 0, kind: input, shape index: {}]   ;;  %s3118_s1 = inlined_call_operand.hbm [shape: f32[2,8,16,32], index: 1, kind: input, shape index: {}]   ;;  %s3119_s2 = inlined_call_operand.vmem [shape: f32[32,1], index: 2, kind: input, shape index: {}]   ;;  %s3120_s3 = inlined_call_operand.hbm [shape: f32[2,16,32], index: 3, kind: output, shape index: {}]  }
   0x1   :  { %8 = sst [smem:[#allocation2]] %s3117_s0 }
   0x2   :  { %9 = vsyncpa [#allocation4], 0 }
   0x3   :  { %11 = vsyncpa [#allocation4 + $0x1], 0 }
   0x4   :  { %12 = vsyncpa [#allocation5], 0 }
   0x5   :  { %14 = vsyncpa [#allocation5 + $0x1], 0  ;;  %s2491_s14 = smov 0   ;;  %s2493_s15 = smov 0  }
   0x6   :  { %s2495_s16 = smov 0   ;;  %s2497_s17 = smov 0  }
   0x7   :  { %s2499_s18 = smov 0   ;;  %s2501_s19 = smov 0  }
   0x8 LB: > { %s1785_s0 = sadd.s32 4294967295, %s2459_s19   ;;  %s1786_s20 = sadd.s32 4294967294, %s2459_s19   ;;  %s2459_s19 = sphi %s2501_s19, %s20_s19   ;;  %s2455_s18 = sphi %s2499_s18, %s3147_s18   ;;  %s2451_s17 = sphi %s2497_s17, %s3146_s17   ;;  %s2447_s16 = sphi %s2495_s16, %s3145_s16   ;;  %s2443_s15 = sphi %s2493_s15, %s3144_s15   ;;  %s2439_s14 = sphi %s2491_s14, %s3143_s14  }
   0x9   : > { %s32_s21 = sadd.s32 1, %s2455_s18  ;;  %s62_s22 = sadd.s32 1, %s2447_s16 }
   0xa   : > { %p34_p0 = scmp.ge.s32.totalorder %s32_s21, 2  ;;  %p69_p1 = scmp.ne.s32.totalorder %s2447_s16, %s2443_s15 }
   0xb   : > { %p70_p2 = scmp.eq.s32.totalorder %s2459_s19, 0  ;;  %p75_p3 = scmp.ne.s32.totalorder %s2443_s15, %s2439_s14 }
   0xc   : > { %s3149_s21 = smov (%p34_p0, %s32_s21), 0  ;;  %p76_p5 = scmp.eq.s32.totalorder %s1785_s0, 0 }
   0xd   : > { %p2532_p4 = por %p70_p2, %p69_p1  ;;  %s57_s24 = ssub.s32 %s2455_s18, %s3149_s21 }
   0xe   : > { %p122_p6 = scmp.eq.s32.totalorder %s1785_s0, 1  ;;  %p60_p7 = scmp.eq.s32.totalorder %s57_s24, 0 }
   0xf   : > { %p2538_p8 = por %p76_p5, %p75_p3  ;;  %p128_p10 = scmp.eq.s32.totalorder %s1786_s20, 1 }
  0x10   : > { %p2542_p9 = por %p122_p6, %p69_p1  ;;  %p2254_p13 = scmp.lt.s32.totalorder %s2459_s19, 2 }
  0x11   : > { %s2547_s27 = scalar_select %p60_p7, %s2447_s16, %s62_s22  }
  0x12   : > { %s3128_s26 = scalar_select %p2542_p9, 1, 0 }
  0x13   : > { %p2549_p11 = por %p128_p10, %p75_p3  ;;  %s154_s29 = sand.u32 1, %s2447_s16  }
  0x14   : > { %s1789_s30 = sshll.u32 %s154_s29, 7  ;;  %s1800_s4 = sshll.u32 %s2455_s18, 11 }
  0x15   : > { %s3129_s28 = scalar_select %p2549_p11, 1, 0 }
  0x16   : > { %s2560_s7 = scalar_lea.hbm %s3118_s1, %s1800_s4  ;;  %s158_s8 = scalar_lea.vmem [#allocation3], %s1789_s30 }
  0x17   : > { %s167_s9 = sshll.u32 %s158_s8, 4  ;;  %p2566_p0 = pnand %p2254_p13, %p2532_p4  ;;  %s2562_s9 = int_to_ptr.vmem [resolvable:$true] %s167_s9 }
  0x18   : > { %s2571_s11 = scalar_lea.sflag [#allocation4], %s154_s29  ;;  %s2347_s12 = scalar_lea.hbm %s2560_s7, 2048 }
  0x19   : > { %p2348_p2 = scmp.ne.s32.totalorder %s2560_s7, %s2347_s12  ;;  %p2349_p3 = pneg %p2566_p0 }
  0x1a   : > { %s2352_s20 = scalar_lea.hbm %s3118_s1, 4096  ;;  %p2353_p4 = scmp.lt.u32.totalorder %s2560_s7, %s3118_s1 }
  0x1b   : > { %p2350_p5 = pnand %p2349_p3, %p2348_p2  ;;  %p2354_p7 = scmp.lt.u32.totalorder %s2352_s20, %s2347_s12 }
  0x1c   : > { %p2356_p13 = scmp.lt.u32.totalorder %s2347_s12, %s2560_s7 }
  0x1d   : > { %p2351_p6 = pneg %p2350_p5  ;;  %p2355_p10 = por %p2354_p7, %p2353_p4 }
  0x1f   : > { %p2357_p12 = por %p2356_p13, %p2355_p10 }
  0x21   : > { %p2358_p1 = pnand %p2357_p12, %p2351_p6 }
  0x23   : > { %2361 = shalt.err (!%p2358_p1)
}
  0x24   : > { %s2362_s24 = scalar_lea.vmem %s2562_s9, 2048  ;;  %s2461_s29 = smov [#allocation3]  }
  0x25   : > { %p2363_p2 = scmp.ne.s32.totalorder %s2562_s9, %s2362_s24  ;;  %s2367_s30 = sshll.u32 %s2461_s29, 4  ;;  %s2368_s30 = int_to_ptr.vmem [resolvable:$false] %s2367_s30 }
  0x26   : > { %s2369_s4 = scalar_lea.vmem %s2368_s30, 4096  ;;  %p2370_p9 = scmp.lt.s32.totalorder %s2562_s9, %s2368_s30 }
  0x27   : > { %p2365_p5 = pnand %p2363_p2, %p2349_p3  ;;  %p2371_p4 = scmp.lt.s32.totalorder %s2369_s4, %s2362_s24 }
  0x29   : > { %p2366_p11 = pneg %p2365_p5  ;;  %p2372_p7 = por %p2371_p4, %p2370_p9 }
  0x2b   : > { %p2373_p10 = pnand %p2372_p7, %p2366_p11 }
  0x2d   : > { %2376 = shalt.err (!%p2373_p10)
}
  0x2e   : > { %s2462_s5 = smov 128   ;;  %s2463_s6 = smov 8  }
  0x2f   : > { %2249 = dma.hbm_to_vmem [thread:$0]  (!%p2566_p0), %s2560_s7, 2048, %s2562_s9, %s2571_s11, %s2462_s5, %s2462_s5, %s2463_s6  }
  0x30   : > { %p175_p12 = scmp.lt.s32.totalorder %s2459_s19, 3  ;;  %p3131_p1 = scmp.ge.s32.totalorder %s2459_s19, 1 }
  0x32   : > { %p176_p3 = pnand %p3131_p1, %p175_p12 }
  0x34   : > { %179 = sbr.rel (%p176_p3) target bundleno = 614 (0x266), region = 32 }
  0x3b   : > { %s2603_s8 = sand.u32 1, %s2443_s15  }
  0x3c   : > { %s1793_s12 = sshll.u32 %s2603_s8, 7  ;;  %s182_s13 = scalar_lea.sflag [#allocation4], %s2603_s8 }
  0x3d   : > { %s2607_s0 = scalar_lea.vmem [#allocation3], %s1793_s12 }
  0x3e   : > { %2430 = dma.done.wait (%p2538_p8), %s182_s13, 2048  }
  0x3f   : > { %2432 = vsyncadd (%p2538_p8), %s182_s13, 4294965248  ;;  %vm230_vm0 = vcmask 261120   ;;  %v226_v0 = vld [vmem:[%s3119_s2] sm:$0xff]  ;;  %v227_v1 = vld [vmem:[%s3119_s2 + $0x8] sm:$0xff]  ;;  %s1409_s24 = sld [smem:[#allocation2]]  ;;  %vm1427_vm1 = vcmask 7168  }
  0x40   : > { %v2622_v2 = vld [vmem:[%s3119_s2 + $0x10] sm:$0xff]  ;;  %v280_v3 = vand.u32 4294901760, %v226_v0  ;;  %v283_v4 = vand.u32 4294901760, %v227_v1  ;;  %v2627_v5 = vld [vmem:[%s3119_s2 + $0x18] sm:$0xff]  ;;  %v2631_v7 = vld [vmem:[%s2607_s0] sm:$0xff]  ;;  %s1794_s29 = sshll.u32 %s2603_s8, 4 }
  0x41   : > { %v286_v6 = vand.u32 4294901760, %v2622_v2  ;;  %v2634_v8 = vld [vmem:[%s2607_s0 + $0x8] sm:$0xff]  ;;  %v289_v9 = vand.u32 4294901760, %v2627_v5  ;;  %v232_v10 = vsel %vm230_vm0, %v2631_v7, 0  ;;  %v2642_v12 = vld [vmem:[%s2607_s0 + $0x10] sm:$0xff]  ;;  %v2645_v13 = vld [vmem:[%s2607_s0 + $0x18] sm:$0xff] }
  0x42   : > { %v235_v11 = vsel %vm230_vm0, %v2634_v8, 0  ;;  %v2647_v14 = vpack.c.bf16 %v283_v4, %v280_v3  ;;  %v2649_v15 = vand.u32 4294901760, %v232_v10  ;;  %v2653_v17 = vsub.f32 %v226_v0, %v280_v3  ;;  %v2656_v18 = vld [vmem:[%s2607_s0 + $0x20] sm:$0xff]  ;;  %v2659_v19 = vld [vmem:[%s2607_s0 + $0x28] sm:$0xff]  ;;  %v2708_v40 = vld [vmem:[%s2607_s0 + $0x30] sm:$0xff]  ;;  %s1801_s30 = sshll.u32 %s2451_s17, 8 }
  0x43   : > { %v2651_v16 = vand.u32 4294901760, %v235_v11  ;;  %v2665_v20 = vpack.c.bf16 %v289_v9, %v286_v6  ;;  %v2667_v21 = vsub.f32 %v227_v1, %v283_v4  ;;  %v238_v22 = vsel %vm230_vm0, %v2642_v12, 0  ;;  %v2722_v49 = vld [vmem:[%s2607_s0 + $0x38] sm:$0xff]  ;;  %v2725_v50 = vld [vmem:[%s2607_s0 + $0x40] sm:$0xff]  ;;  %v2736_v59 = vld [vmem:[%s2607_s0 + $0x48] sm:$0xff]  ;;  %s207_s4 = scalar_lea.vmem [#allocation6], %s1794_s29  ;;  %s3064_s17 = scalar_lea.hbm %s3120_s3, %s1801_s30 }
  0x44   : > { %v241_v23 = vsel %vm230_vm0, %v2645_v13, 0  ;;  %2115 = vmatprep.subr.bf16.mxu1 %v2647_v14  ;;  %2139 = vmatprep.subr.bf16.mxu0 %v2647_v14  ;;  %v2676_v24 = vsub.f32 %v232_v10, %v2649_v15  ;;  %v511_v26 = vand.u32 4294901760, %v2653_v17  ;;  %v2682_v27 = vand.u32 4294901760, %v238_v22  ;;  %s1698_s5 = sshll.u32 %s207_s4, 4  ;;  %s1683_s13 = scalar_lea.sflag [#allocation5], %s2603_s8  ;;  %s3066_s5 = int_to_ptr.vmem [resolvable:$true] %s1698_s5 }
  0x45   : > { %v2679_v25 = vsub.f32 %v235_v11, %v2651_v16  ;;  %2117 = vmatpush3.bf16.msra.mxu1 %v2647_v14  ;;  %2141 = vmatpush3.bf16.msra.mxu0 %v2647_v14  ;;  %v518_v28 = vand.u32 4294901760, %v2667_v21  ;;  %v2687_v29 = vand.u32 4294901760, %v241_v23  ;;  %v244_v30 = vsel %vm230_vm0, %v2656_v18, 0  ;;  %p3140_p9 = scmp.ne.s32.totalorder %s3128_s26, 0  ;;  %s2465_s7 = smov [#allocation6]  }
  0x46   : > { %v247_v31 = vsel %vm230_vm0, %v2659_v19, 0  ;;  %2119 = vmatprep.subr.bf16.mxu1 %v2665_v20  ;;  %2143 = vmatprep.subr.bf16.mxu0 %v2665_v20  ;;  %v350_v32 = vand.u32 4294901760, %v2676_v24  ;;  %v512_v34 = vsub.f32 %v2653_v17, %v511_v26  ;;  %v2699_v35 = vsub.f32 %v238_v22, %v2682_v27  ;;  %s2381_s9 = sshll.u32 %s2465_s7, 4  ;;  %s2382_s9 = int_to_ptr.vmem [resolvable:$false] %s2381_s9 }
  0x47   : > { %v360_v33 = vand.u32 4294901760, %v2679_v25  ;;  %v519_v36 = vsub.f32 %v2667_v21, %v518_v28  ;;  %v2146_v37 = vpack.c.bf16 %v518_v28, %v511_v26  ;;  %v2703_v38 = vsub.f32 %v241_v23, %v2687_v29  ;;  %v2761_v26 = vld [vmem:[%s2607_s0 + $0x50] sm:$0xff]  ;;  %s2383_s10 = scalar_lea.vmem %s2382_s9, 512  ;;  %p2384_p6 = scmp.lt.s32.totalorder %s3066_s5, %s2382_s9 }
  0x48   : > { %v2705_v39 = vand.u32 4294901760, %v244_v30  ;;  %v351_v41 = vsub.f32 %v2676_v24, %v350_v32  ;;  %2026 = vmatprep.mubr.f32.mxu0 %v350_v32  ;;  %v513_v43 = vand.u32 4294901760, %v512_v34  ;;  %v370_v44 = vand.u32 4294901760, %v2699_v35  ;;  %3132 = vst [vmem:[#allocation9_spill] sm:$0xff] %v2761_v26 }
  0x49   : > { %v361_v42 = vsub.f32 %v2679_v25, %v360_v33  ;;  %2121 = vmatpush3.bf16.msra.mxu1 %v2665_v20  ;;  %2145 = vmatpush3.bf16.msra.mxu0 %v2665_v20  ;;  %v520_v45 = vand.u32 4294901760, %v519_v36  ;;  %v380_v46 = vand.u32 4294901760, %v2703_v38  ;;  %v2719_v48 = vand.u32 4294901760, %v247_v31  ;;  %v2780_v36 = vld [vmem:[%s2607_s0 + $0x58] sm:$0xff] }
  0x4a   : > { %v2717_v47 = vsub.f32 %v244_v30, %v2705_v39  ;;  %v352_v51 = vand.u32 4294901760, %v351_v41  ;;  %2147 = vmatprep.subr.bf16.mxu0 %v2146_v37  ;;  %v371_v53 = vsub.f32 %v2699_v35, %v370_v44  ;;  %v250_v54 = vsel %vm230_vm0, %v2708_v40, 0 }
  0x4b   : > { %v362_v52 = vand.u32 4294901760, %v361_v42  ;;  %v2122_v55 = vpack.c.bf16 %v520_v45, %v513_v43  ;;  %v381_v56 = vsub.f32 %v2703_v38, %v380_v46  ;;  %v2733_v58 = vsub.f32 %v247_v31, %v2719_v48 }
  0x4c   : > { %v390_v57 = vand.u32 4294901760, %v2717_v47  ;;  %1930 = vmatprep.mubr.f32.mxu1 %v352_v51  ;;  %2027 = vmatmul.mubr.f32.vlgmr.msra.gmra.mrb[0].mxu0 %v360_v33  ;;  %v372_v60 = vand.u32 4294901760, %v371_v53  ;;  %v2738_v61 = vand.u32 4294901760, %v250_v54  ;;  %v253_v62 = vsel %vm230_vm0, %v2722_v49, 0 }
  0x4d   : > { %v256_v63 = vsel %vm230_vm0, %v2725_v50, 0  ;;  %1931 = vmatmul.mubr.f32.vlgmr.msra.gmra.mrb[0].mxu1 %v362_v52  ;;  %2123 = vmatprep.subr.bf16.mxu1 %v2122_v55  ;;  %v382_v0 = vand.u32 4294901760, %v381_v56  ;;  %v400_v3 = vand.u32 4294901760, %v2733_v58  ;;  %v2746_v4 = vand.u32 4294901760, %v253_v62 }
  0x4e   : > { %v391_v1 = vsub.f32 %v2717_v47, %v390_v57  ;;  %2125 = vmatpush3.bf16.msra.mxu1 %v2122_v55  ;;  %2149 = vmatpush3.bf16.msra.mxu0 %v2146_v37  ;;  %v2749_v10 = vsub.f32 %v250_v54, %v2738_v61  ;;  %v2751_v11 = vand.u32 4294901760, %v256_v63  ;;  %v259_v22 = vsel %vm230_vm0, %v2736_v59, 0  ;;  %v2799_v54 = vld [vmem:[%s2607_s0 + $0x60] sm:$0xff] }
  0x4f   : > { %v2758_v23 = vsub.f32 %v2622_v2, %v286_v6  ;;  %1933 = vmatprep.mubr.f32.mxu1 %v372_v60  ;;  %2029 = vmatprep.mubr.f32.mxu0 %v370_v44  ;;  %v401_v30 = vsub.f32 %v2733_v58, %v400_v3  ;;  %v2765_v31 = vsub.f32 %v253_v62, %v2746_v4  ;;  %v2767_v32 = vand.u32 4294901760, %v259_v22  ;;  %v2804_v62 = vld [vmem:[%s2607_s0 + $0x68] sm:$0xff] }
  0x50   : > { %v392_v28 = vand.u32 4294901760, %v391_v1  ;;  %2030 = vmatmul.mubr.f32.gmra.mrb[2].mxu0 %v380_v46  ;;  %v410_v33 = vand.u32 4294901760, %v2749_v10  ;;  %v2771_v34 = vsub.f32 %v256_v63, %v2751_v11  ;;  %v2777_v6 = vsub.f32 %v2627_v5, %v289_v9  ;;  %3133 = vst [vmem:[#allocation10_spill] sm:$0xff] %v2799_v54 }
  0x51   : > { %v525_v2 = vand.u32 4294901760, %v2758_v23  ;;  %1934 = vmatmul.mubr.f32.gmra.mrb[2].mxu1 %v382_v0  ;;  %2032 = vmatprep.mubr.f32.mxu0 %v390_v57  ;;  %v402_v37 = vand.u32 4294901760, %v401_v30  ;;  %v420_v41 = vand.u32 4294901760, %v2765_v31  ;;  %v2784_v42 = vsub.f32 %v259_v22, %v2767_v32 }
  0x52   : > { %v262_v43 = vsel %vm230_vm0, %v2761_v26, 0  ;;  %1936 = vmatprep.mubr.f32.mxu1 %v392_v28  ;;  %v411_v44 = vsub.f32 %v2749_v10, %v410_v33  ;;  %v430_v5 = vand.u32 4294901760, %v2771_v34  ;;  %v532_v45 = vand.u32 4294901760, %v2777_v6  ;;  %v2811_v28 = vld [vmem:[%s2607_s0 + $0x70] sm:$0xff]  ;;  %v2818_v26 = vld [vmem:[%s2607_s0 + $0x78] sm:$0xff]  ;;  %s2377_s0 = scalar_lea.vmem %s3066_s5, 256 }
  0x53   : > { %v526_v9 = vsub.f32 %v2758_v23, %v525_v2  ;;  %v421_v46 = vsub.f32 %v2765_v31, %v420_v41  ;;  %v440_v51 = vand.u32 4294901760, %v2784_v42  ;;  %v2794_v52 = vand.u32 4294901760, %v262_v43  ;;  %3134 = vst [vmem:[#allocation11_spill] sm:$0xff] %v2811_v28  ;;  %3135 = vst [vmem:[#allocation12_spill] sm:$0xff] %v2818_v26  ;;  %p2378_p8 = scmp.ne.s32.totalorder %s3066_s5, %s2377_s0  ;;  %p2385_p13 = scmp.lt.s32.totalorder %s2383_s10, %s2377_s0 }
  0x54   : > { %v265_v53 = vsel %vm230_vm0, %v2780_v36, 0  ;;  %2033 = vmatmul.mubr.f32.gmra.mrb[4].mxu0 %v400_v3  ;;  %v412_v55 = vand.u32 4294901760, %v411_v44  ;;  %v431_v56 = vsub.f32 %v2771_v34, %v430_v5  ;;  %v533_v60 = vsub.f32 %v2777_v6, %v532_v45 }
  0x55   : > { %v527_v57 = vand.u32 4294901760, %v526_v9  ;;  %1937 = vmatmul.mubr.f32.gmra.mrb[4].mxu1 %v402_v37  ;;  %2035 = vmatprep.mubr.f32.mxu0 %v410_v33  ;;  %v422_v63 = vand.u32 4294901760, %v421_v46  ;;  %v441_v0 = vsub.f32 %v2784_v42, %v440_v51  ;;  %v2150_v1 = vpack.c.bf16 %v532_v45, %v525_v2  ;;  %p2379_p11 = pnand %p2378_p8, %p3140_p9  ;;  %p2386_p2 = por %p2385_p13, %p2384_p6 }
  0x56   : > { %v2808_v22 = vsub.f32 %v262_v43, %v2794_v52  ;;  %1939 = vmatprep.mubr.f32.mxu1 %v412_v55  ;;  %v432_v3 = vand.u32 4294901760, %v431_v56  ;;  %v534_v30 = vand.u32 4294901760, %v533_v60  ;;  %v2813_v44 = vand.u32 4294901760, %v265_v53 }
  0x57   : > { %v268_v9 = vsel %vm230_vm0, %v2799_v54, 0  ;;  %v442_v33 = vand.u32 4294901760, %v441_v0  ;;  %2151 = vmatprep.subr.bf16.mxu0 %v2150_v1  ;;  %v271_v43 = vsel %vm230_vm0, %v2804_v62, 0  ;;  %v274_v56 = vsel %vm230_vm0, %v2811_v28, 0  ;;  %p2380_p0 = pneg %p2379_p11 }
  0x58   : > { %v450_v37 = vand.u32 4294901760, %v2808_v22  ;;  %v2821_v2 = vand.u32 4294901760, %v268_v9  ;;  %2036 = vmatmul.mubr.f32.gmra.mrb[6].mxu0 %v420_v41  ;;  %v2126_v45 = vpack.c.bf16 %v534_v30, %v527_v57  ;;  %v2826_v46 = vsub.f32 %v265_v53, %v2813_v44 }
  0x59   : > { %v2828_v55 = vand.u32 4294901760, %v271_v43  ;;  %1940 = vmatmul.mubr.f32.gmra.mrb[6].mxu1 %v422_v63  ;;  %2038 = vmatprep.mubr.f32.mxu0 %v430_v5  ;;  %v2836_v54 = vand.u32 4294901760, %v274_v56  ;;  %v277_v41 = vsel %vm230_vm0, %v2818_v26, 0  ;;  %v2130_v5 = vpack.c.bf16 %v2667_v21, %v2653_v17  ;;  %p2387_p5 = pnand %p2386_p2, %p2380_p0 }
  0x5a   : > { %v451_v60 = vsub.f32 %v2808_v22, %v450_v37  ;;  %v2834_v0 = vsub.f32 %v268_v9, %v2821_v2  ;;  %1942 = vmatprep.mubr.f32.mxu1 %v432_v3  ;;  %2127 = vmatprep.subr.bf16.mxu1 %v2126_v45  ;;  %v460_v53 = vand.u32 4294901760, %v2826_v46  ;;  %v2844_v30 = vand.u32 4294901760, %v277_v41 }
  0x5b   : > { %v2842_v57 = vsub.f32 %v271_v43, %v2828_v55  ;;  %2129 = vmatpush3.bf16.msra.mxu1 %v2126_v45  ;;  %2153 = vmatpush3.bf16.msra.mxu0 %v2150_v1  ;;  %v2850_v28 = vsub.f32 %v274_v56, %v2836_v54 }
  0x5c   : > { %v452_v63 = vand.u32 4294901760, %v451_v60  ;;  %v470_v9 = vand.u32 4294901760, %v2834_v0  ;;  %2039 = vmatmul.mubr.f32.gmra.mrb[8].mxu0 %v440_v51  ;;  %v461_v3 = vsub.f32 %v2826_v46, %v460_v53  ;;  %v2855_v43 = vsub.f32 %v277_v41, %v2844_v30  ;;  %2131 = vmatprep.subr.bf16.mxu1 %v2130_v5 }
  0x5d   : > { %v480_v26 = vand.u32 4294901760, %v2842_v57  ;;  %1943 = vmatmul.mubr.f32.gmra.mrb[8].mxu1 %v442_v33  ;;  %2041 = vmatprep.mubr.f32.mxu0 %v450_v37  ;;  %v490_v21 = vand.u32 4294901760, %v2850_v28 }
  0x5e   : > { %v471_v17 = vsub.f32 %v2834_v0, %v470_v9  ;;  %1945 = vmatprep.mubr.f32.mxu1 %v452_v63  ;;  %v462_v1 = vand.u32 4294901760, %v461_v3  ;;  %v500_v51 = vand.u32 4294901760, %v2855_v43  ;;  %2155 = vmatprep.subr.bf16.mxu0 %v2647_v14 }
  0x5f   : > { %v481_v45 = vsub.f32 %v2842_v57, %v480_v26  ;;  %v491_v60 = vsub.f32 %v2850_v28, %v490_v21 }
  0x60   : > { %v472_v56 = vand.u32 4294901760, %v471_v17  ;;  %2042 = vmatmul.mubr.f32.gmra.mrb[10].mxu0 %v460_v53  ;;  %v501_v37 = vsub.f32 %v2855_v43, %v500_v51  ;;  %v2134_v53 = vpack.c.bf16 %v2777_v6, %v2758_v23 }
  0x61   : > { %1946 = vmatmul.mubr.f32.gmra.mrb[10].mxu1 %v462_v1  ;;  %2044 = vmatprep.mubr.f32.mxu0 %v470_v9  ;;  %v482_v33 = vand.u32 4294901760, %v481_v45  ;;  %v492_v41 = vand.u32 4294901760, %v491_v60 }
  0x62   : > { %1948 = vmatprep.mubr.f32.mxu1 %v472_v56  ;;  %v502_v63 = vand.u32 4294901760, %v501_v37 }
  0x64   : > { %2045 = vmatmul.mubr.f32.gmra.mrb[12].mxu0 %v480_v26 }
  0x65   : > { %1949 = vmatmul.mubr.f32.gmra.mrb[12].mxu1 %v482_v33  ;;  %2047 = vmatprep.mubr.f32.mxu0 %v490_v21 }
  0x66   : > { %1951 = vmatprep.mubr.f32.mxu1 %v492_v41 }
  0x68   : > { %2048 = vmatmul.mubr.f32.gmra.mrb[14].mxu0 %v500_v51 }
  0x69   : > { %1952 = vmatmul.mubr.f32.gmra.mrb[14].mxu1 %v502_v63  ;;  %2058 = vmatprep.mubr.f32.mxu0 %v2649_v15 }
  0x6a   : > { %1962 = vmatprep.mubr.f32.mxu1 %v2649_v15 }
  0x6c   : > { %2059 = vmatmul.mubr.f32.vlgmr.msra.gmra.mrb[0].mxu0 %v2651_v16 }
  0x6d   : > { %1963 = vmatmul.mubr.f32.vlgmr.msra.gmra.mrb[0].mxu1 %v2651_v16  ;;  %2157 = vmatpush3.bf16.msra.mxu0 %v2647_v14  ;;  %v2464_v14 = vmov 0  }
  0x6e   : > { %2133 = vmatpush3.bf16.msra.mxu1 %v2130_v5  ;;  %1965 = vmatprep.mubr.f32.mxu1 %v2682_v27 }
  0x6f   : > { %2061 = vmatprep.mubr.f32.mxu0 %v2682_v27  ;;  %2135 = vmatprep.subr.bf16.mxu1 %v2134_v53 }
  0x70   : > { %2062 = vmatmul.mubr.f32.gmra.mrb[2].mxu0 %v2687_v29  ;;  %2159 = vmatprep.subr.bf16.mxu0 %v2665_v20 }
  0x71   : > { %1966 = vmatmul.mubr.f32.gmra.mrb[2].mxu1 %v2687_v29  ;;  %2064 = vmatprep.mubr.f32.mxu0 %v2705_v39 }
  0x72   : > { %1968 = vmatprep.mubr.f32.mxu1 %v2705_v39  ;;  %2137 = vmatpush3.bf16.msra.mxu1 %v2134_v53 }
  0x73   : > { %2161 = vmatpush3.bf16.msra.mxu0 %v2665_v20  ;;  %2310 = vset.pattern.permute.xlu1 %v2464_v14 }
  0x74   : > { %2065 = vmatmul.mubr.f32.gmra.mrb[4].mxu0 %v2719_v48  ;;  %2309 = vset.pattern.permute.xlu0 %v2464_v14 }
  0x75   : > { %1969 = vmatmul.mubr.f32.gmra.mrb[4].mxu1 %v2719_v48  ;;  %2067 = vmatprep.mubr.f32.mxu0 %v2738_v61 }
  0x76   : > { %1971 = vmatprep.mubr.f32.mxu1 %v2738_v61 }
  0x78   : > { %2068 = vmatmul.mubr.f32.gmra.mrb[6].mxu0 %v2746_v4 }
  0x79   : > { %1972 = vmatmul.mubr.f32.gmra.mrb[6].mxu1 %v2746_v4  ;;  %2070 = vmatprep.mubr.f32.mxu0 %v2751_v11 }
  0x7a   : > { %1974 = vmatprep.mubr.f32.mxu1 %v2751_v11 }
  0x7c   : > { %2071 = vmatmul.mubr.f32.gmra.mrb[8].mxu0 %v2767_v32 }
  0x7d   : > { %1975 = vmatmul.mubr.f32.gmra.mrb[8].mxu1 %v2767_v32  ;;  %2073 = vmatprep.mubr.f32.mxu0 %v2794_v52 }
  0x7e   : > { %1977 = vmatprep.mubr.f32.mxu1 %v2794_v52 }
  0x80   : > { %2074 = vmatmul.mubr.f32.gmra.mrb[10].mxu0 %v2813_v44 }
  0x81   : > { %1978 = vmatmul.mubr.f32.gmra.mrb[10].mxu1 %v2813_v44  ;;  %2076 = vmatprep.mubr.f32.mxu0 %v2821_v2 }
  0x82   : > { %1980 = vmatprep.mubr.f32.mxu1 %v2821_v2 }
  0x84   : > { %2077 = vmatmul.mubr.f32.gmra.mrb[12].mxu0 %v2828_v55 }
  0x85   : > { %1981 = vmatmul.mubr.f32.gmra.mrb[12].mxu1 %v2828_v55  ;;  %2079 = vmatprep.mubr.f32.mxu0 %v2836_v54 }
  0x86   : > { %1983 = vmatprep.mubr.f32.mxu1 %v2836_v54 }
  0x88   : > { %2080 = vmatmul.mubr.f32.gmra.mrb[14].mxu0 %v2844_v30 }
  0x89   : > { %1984 = vmatmul.mubr.f32.gmra.mrb[14].mxu1 %v2844_v30  ;;  %2090 = vmatprep.mubr.f32.mxu0 %v2649_v15 }
  0x8a   : > { %1994 = vmatprep.mubr.f32.mxu1 %v2676_v24 }
  0x8c   : > { %2091 = vmatmul.mubr.f32.vlgmr.msra.gmra.mrb[0].mxu0 %v2651_v16 }
  0x8d   : > { %1995 = vmatmul.mubr.f32.vlgmr.msra.gmra.mrb[0].mxu1 %v2679_v25  ;;  %2093 = vmatprep.mubr.f32.mxu0 %v2682_v27 }
  0x8e   : > { %1997 = vmatprep.mubr.f32.mxu1 %v2699_v35 }
  0x90   : > { %2094 = vmatmul.mubr.f32.gmra.mrb[2].mxu0 %v2687_v29 }
  0x91   : > { %1998 = vmatmul.mubr.f32.gmra.mrb[2].mxu1 %v2703_v38  ;;  %2096 = vmatprep.mubr.f32.mxu0 %v2705_v39  ;;  %v2933_v39 = vstv %s1409_s24 }
  0x92   : > { %2000 = vmatprep.mubr.f32.mxu1 %v2717_v47 }
  0x94   : > { %2097 = vmatmul.mubr.f32.gmra.mrb[4].mxu0 %v2719_v48 }
  0x95   : > { %2001 = vmatmul.mubr.f32.gmra.mrb[4].mxu1 %v2733_v58  ;;  %2099 = vmatprep.mubr.f32.mxu0 %v2738_v61 }
  0x96   : > { %2003 = vmatprep.mubr.f32.mxu1 %v2749_v10 }
  0x98   : > { %2100 = vmatmul.mubr.f32.gmra.mrb[6].mxu0 %v2746_v4 }
  0x99   : > { %2004 = vmatmul.mubr.f32.gmra.mrb[6].mxu1 %v2765_v31  ;;  %2102 = vmatprep.mubr.f32.mxu0 %v2751_v11 }
  0x9a   : > { %2006 = vmatprep.mubr.f32.mxu1 %v2771_v34 }
  0x9c   : > { %2103 = vmatmul.mubr.f32.gmra.mrb[8].mxu0 %v2767_v32 }
  0x9d   : > { %2007 = vmatmul.mubr.f32.gmra.mrb[8].mxu1 %v2784_v42  ;;  %2105 = vmatprep.mubr.f32.mxu0 %v2794_v52 }
  0x9e   : > { %2009 = vmatprep.mubr.f32.mxu1 %v2808_v22 }
  0xa0   : > { %2106 = vmatmul.mubr.f32.gmra.mrb[10].mxu0 %v2813_v44 }
  0xa1   : > { %2010 = vmatmul.mubr.f32.gmra.mrb[10].mxu1 %v2826_v46  ;;  %2108 = vmatprep.mubr.f32.mxu0 %v2821_v2 }
  0xa2   : > { %2012 = vmatprep.mubr.f32.mxu1 %v2834_v0 }
  0xa4   : > { %2109 = vmatmul.mubr.f32.gmra.mrb[12].mxu0 %v2828_v55 }
  0xa5   : > { %2013 = vmatmul.mubr.f32.gmra.mrb[12].mxu1 %v2842_v57  ;;  %2111 = vmatprep.mubr.f32.mxu0 %v2836_v54 }
  0xa6   : > { %2015 = vmatprep.mubr.f32.mxu1 %v2850_v28 }
  0xa8   : > { %2112 = vmatmul.mubr.f32.gmra.mrb[14].mxu0 %v2844_v30 }
  0xa9   : > { %2016 = vmatmul.mubr.f32.gmra.mrb[14].mxu1 %v2855_v43 }
 0x15f   : > { %v2092_v15 = vpop.f32.mrb[0].mxu0 }
 0x160   : > { %v1996_v16 = vpop.f32.mrb[0].mxu1  ;;  %v1315_v20 = vpop.f32.mrb[1].mxu0 }
 0x161   : > { %v2162_v24 = vadd.f32 %v2092_v15, %v1996_v16  ;;  %v765_v25 = vpop.f32.mrb[1].mxu1 }
 0x162   : > { %v2163_v27 = vadd.f32 %v1315_v20, %v765_v25 }
 0x163   : > { %v2095_v29 = vpop.f32.mrb[2].mxu0  ;;  %v2936_v4 = vadd.f32 %v2162_v24, %v2933_v39 }
 0x164   : > { %v1999_v35 = vpop.f32.mrb[2].mxu1  ;;  %v1327_v38 = vpop.f32.mrb[3].mxu0  ;;  %v2939_v23 = vadd.f32 %v2163_v27, %v2933_v39 }
 0x165   : > { %v2164_v47 = vadd.f32 %v2095_v29, %v1999_v35  ;;  %v779_v48 = vpop.f32.mrb[3].mxu1  ;;  %v1443_v42 = vsel %vm1427_vm1, %v2936_v4, -inf }
 0x166   : > { %v2165_v58 = vadd.f32 %v1327_v38, %v779_v48  ;;  %v1428_v28 = vsel %vm1427_vm1, %v2939_v23, -inf }
 0x167   : > { %v2098_v61 = vpop.f32.mrb[4].mxu0  ;;  %v2952_v44 = vadd.f32 %v2164_v47, %v2933_v39 }
 0x168   : > { %v2002_v10 = vpop.f32.mrb[4].mxu1  ;;  %v1339_v11 = vpop.f32.mrb[5].mxu0  ;;  %v2957_v0 = vadd.f32 %v2165_v58, %v2933_v39 }
 0x169   : > { %v2166_v26 = vadd.f32 %v2098_v61, %v2002_v10  ;;  %v793_v31 = vpop.f32.mrb[5].mxu1  ;;  %v1444_v45 = vsel %vm1427_vm1, %v2952_v44, -inf }
 0x16a   : > { %v2167_v32 = vadd.f32 %v1339_v11, %v793_v31  ;;  %v1429_v33 = vsel %vm1427_vm1, %v2957_v0, -inf }
 0x16b   : > { %v2942_v34 = vadd.f32 %v2166_v26, %v2933_v39  ;;  %v2101_v6 = vpop.f32.mrb[6].mxu0 }
 0x16c   : > { %v2947_v52 = vadd.f32 %v2167_v32, %v2933_v39  ;;  %v2005_v54 = vpop.f32.mrb[6].mxu1  ;;  %v1351_v22 = vpop.f32.mrb[7].mxu0 }
 0x16d   : > { %v1445_v2 = vsel %vm1427_vm1, %v2942_v34, -inf  ;;  %v2168_v46 = vadd.f32 %v2101_v6, %v2005_v54  ;;  %v807_v55 = vpop.f32.mrb[7].mxu1 }
 0x16e   : > { %v1446_v57 = vmax.f32 %v1443_v42, %v1445_v2  ;;  %v1430_v30 = vsel %vm1427_vm1, %v2947_v52, -inf  ;;  %v2169_v5 = vadd.f32 %v1351_v22, %v807_v55 }
 0x16f   : > { %v1431_v9 = vmax.f32 %v1428_v28, %v1430_v30  ;;  %v2962_v3 = vadd.f32 %v2168_v46, %v2933_v39  ;;  %v2104_v43 = vpop.f32.mrb[8].mxu0 }
 0x170   : > { %v2965_v17 = vadd.f32 %v2169_v5, %v2933_v39  ;;  %v2008_v21 = vpop.f32.mrb[8].mxu1  ;;  %v1363_v1 = vpop.f32.mrb[9].mxu0 }
 0x171   : > { %v1447_v51 = vsel %vm1427_vm1, %v2962_v3, -inf  ;;  %v2170_v56 = vadd.f32 %v2104_v43, %v2008_v21  ;;  %v821_v60 = vpop.f32.mrb[9].mxu1 }
 0x172   : > { %v1448_v37 = vmax.f32 %v1444_v45, %v1447_v51  ;;  %v1432_v41 = vsel %vm1427_vm1, %v2965_v17, -inf  ;;  %v2171_v63 = vadd.f32 %v1363_v1, %v821_v60 }
 0x173   : > { %v1433_v53 = vmax.f32 %v1429_v33, %v1432_v41  ;;  %v1420_v14 = vadd.f32 %v2170_v56, %v2933_v39  ;;  %v2107_v15 = vpop.f32.mrb[10].mxu0 }
 0x174   : > { %v2977_v16 = vadd.f32 %v2171_v63, %v2933_v39  ;;  %v2011_v20 = vpop.f32.mrb[10].mxu1  ;;  %v1375_v24 = vpop.f32.mrb[11].mxu0 }
 0x175   : > { %v1449_v25 = vsel %vm1427_vm1, %v1420_v14, -inf  ;;  %v2172_v27 = vadd.f32 %v2107_v15, %v2011_v20  ;;  %v835_v29 = vpop.f32.mrb[11].mxu1 }
 0x176   : > { %v1450_v35 = vmax.f32 %v1446_v57, %v1449_v25  ;;  %v1434_v38 = vsel %vm1427_vm1, %v2977_v16, -inf  ;;  %v2173_v47 = vadd.f32 %v1375_v24, %v835_v29 }
 0x177   : > { %v1435_v48 = vmax.f32 %v1431_v9, %v1434_v38  ;;  %v1422_v58 = vadd.f32 %v2172_v27, %v2933_v39  ;;  %v2110_v61 = vpop.f32.mrb[12].mxu0 }
 0x178   : > { %v2984_v10 = vadd.f32 %v2173_v47, %v2933_v39  ;;  %v2014_v11 = vpop.f32.mrb[12].mxu1  ;;  %v1387_v26 = vpop.f32.mrb[13].mxu0 }
 0x179   : > { %v1451_v31 = vsel %vm1427_vm1, %v1422_v58, -inf  ;;  %v2174_v32 = vadd.f32 %v2110_v61, %v2014_v11  ;;  %v849_v6 = vpop.f32.mrb[13].mxu1 }
 0x17a   : > { %v1452_v42 = vmax.f32 %v1448_v37, %v1451_v31  ;;  %v1436_v54 = vsel %vm1427_vm1, %v2984_v10, -inf  ;;  %v2175_v22 = vadd.f32 %v1387_v26, %v849_v6 }
 0x17b   : > { %v1437_v28 = vmax.f32 %v1433_v53, %v1436_v54  ;;  %v1424_v2 = vadd.f32 %v2174_v32, %v2933_v39  ;;  %v2113_v46 = vpop.f32.mrb[14].mxu0 }
 0x17c   : > { %v1423_v55 = vadd.f32 %v2175_v22, %v2933_v39  ;;  %v2017_v57 = vpop.f32.mrb[14].mxu1  ;;  %v1399_v30 = vpop.f32.mrb[15].mxu0 }
 0x17d   : > { %v1453_v5 = vsel %vm1427_vm1, %v1424_v2, -inf  ;;  %v2176_v9 = vadd.f32 %v2113_v46, %v2017_v57  ;;  %v863_v43 = vpop.f32.mrb[15].mxu1 }
 0x17e   : > { %v1454_v21 = vmax.f32 %v1450_v35, %v1453_v5  ;;  %v1438_v1 = vsel %vm1427_vm1, %v1423_v55, -inf  ;;  %v2177_v45 = vadd.f32 %v1399_v30, %v863_v43 }
 0x17f   : > { %v1439_v51 = vmax.f32 %v1435_v48, %v1438_v1  ;;  %v1426_v56 = vadd.f32 %v2176_v9, %v2933_v39 }
 0x180   : > { %v1425_v60 = vadd.f32 %v2177_v45, %v2933_v39 }
 0x181   : > { %v1455_v33 = vsel %vm1427_vm1, %v1426_v56, -inf }
 0x182   : > { %v1456_v37 = vmax.f32 %v1452_v42, %v1455_v33  ;;  %v1440_v41 = vsel %vm1427_vm1, %v1425_v60, -inf }
 0x183   : > { %v1441_v63 = vmax.f32 %v1437_v28, %v1440_v41 }
 0x184   : > { %v1457_v53 = vmax.f32 %v1454_v21, %v1456_v37 }
 0x185   : > { %v1442_v15 = vmax.f32 %v1439_v51, %v1441_v63 }
 0x186   : > { %v1465_v20 = vsub.f32 %v2962_v3, %v1457_v53  ;;  %v1467_v24 = vsub.f32 %v1420_v14, %v1457_v53  ;;  %v1469_v25 = vsub.f32 %v1422_v58, %v1457_v53  ;;  %v1471_v27 = vsub.f32 %v1424_v2, %v1457_v53 }
 0x187   : > { %v1473_v29 = vsub.f32 %v1426_v56, %v1457_v53  ;;  %v1460_v35 = vsub.f32 %v2957_v0, %v1442_v15  ;;  %v1462_v38 = vsub.f32 %v2947_v52, %v1442_v15  ;;  %v1464_v39 = vsub.f32 %v2965_v17, %v1442_v15 }
 0x188   : > { %v1466_v47 = vsub.f32 %v2977_v16, %v1442_v15  ;;  %v1468_v48 = vsub.f32 %v2984_v10, %v1442_v15  ;;  %v1470_v61 = vsub.f32 %v1423_v55, %v1442_v15  ;;  %v1472_v11 = vsub.f32 %v1425_v60, %v1442_v15 }
 0x189   : > { %v1459_v26 = vsub.f32 %v2936_v4, %v1457_v53  ;;  %v1461_v3 = vsub.f32 %v2952_v44, %v1457_v53  ;;  %v1463_v14 = vsub.f32 %v2942_v34, %v1457_v53  ;;  %v1458_v58 = vsub.f32 %v2939_v23, %v1442_v15 }
 0x18a   : > { %v1492_v31 = vmul.f32 1.442695, %v1467_v24  ;;  %v1482_v0 = vmul.f32 1.442695, %v1462_v38  ;;  %v1488_v6 = vmul.f32 1.442695, %v1465_v20 }
 0x18b   : > { %v1476_v32 = vmul.f32 1.442695, %v1459_v26  ;;  %v1480_v52 = vmul.f32 1.442695, %v1461_v3  ;;  %v1484_v17 = vmul.f32 1.442695, %v1463_v14 }
 0x18c   : > { %2311 = vpow2.f32 %v1492_v31  ;;  %v1474_v16 = vmul.f32 1.442695, %v1458_v58  ;;  %v1478_v10 = vmul.f32 1.442695, %v1460_v35  ;;  %v1496_v42 = vmul.f32 1.442695, %v1469_v25 }
 0x18d   : > { %2313 = vpow2.f32 %v1482_v0  ;;  %v1486_v4 = vmul.f32 1.442695, %v1464_v39  ;;  %v1500_v44 = vmul.f32 1.442695, %v1471_v27  ;;  %v1490_v34 = vmul.f32 1.442695, %v1466_v47 }
 0x18e   : > { %2315 = vpow2.f32 %v1476_v32  ;;  %v1504_v23 = vmul.f32 1.442695, %v1473_v29  ;;  %v1494_v54 = vmul.f32 1.442695, %v1468_v48  ;;  %v1498_v2 = vmul.f32 1.442695, %v1470_v61 }
 0x18f   : > { %2317 = vpow2.f32 %v1480_v52  ;;  %v1502_v57 = vmul.f32 1.442695, %v1472_v11 }
 0x190   : > { %2319 = vpow2.f32 %v1484_v17 }
 0x191   : > { %2321 = vpow2.f32 %v1488_v6 }
 0x192   : > { %2323 = vpow2.f32 %v1474_v16 }
 0x193   : > { %2325 = vpow2.f32 %v1478_v10 }
 0x194   : > { %2327 = vpow2.f32 %v1496_v42 }
 0x195   : > { %2329 = vpow2.f32 %v1486_v4 }
 0x196   : > { %v2312_v22 = vpop.eup %2311  ;;  %2331 = vpow2.f32 %v1500_v44 }
 0x197   : > { %v3007_v28 = vpop.eup %2313  ;;  %2333 = vpow2.f32 %v1490_v34  ;;  %v1528_v24 = vsel %vm1427_vm1, %v2312_v22, 0.0 }
 0x198   : > { %v2316_v46 = vpop.eup %2315  ;;  %2335 = vpow2.f32 %v1504_v23  ;;  %v1509_v25 = vsel %vm1427_vm1, %v3007_v28, 0.0 }
 0x199   : > { %v2318_v55 = vpop.eup %2317  ;;  %2337 = vpow2.f32 %v1494_v54  ;;  %v1521_v30 = vsel %vm1427_vm1, %v2316_v46, 0.0 }
 0x19a   : > { %v2320_v5 = vpop.eup %2319  ;;  %v1522_v9 = vsel %vm1427_vm1, %v2318_v55, 0.0  ;;  %2339 = vpow2.f32 %v1498_v2 }
 0x19b   : > { %v2322_v43 = vpop.eup %2321  ;;  %v1523_v21 = vadd.f32 %v1522_v9, %v1521_v30  ;;  %v1524_v45 = vsel %vm1427_vm1, %v2320_v5, 0.0  ;;  %2341 = vpow2.f32 %v1502_v57 }
 0x19c   : > { %v2324_v1 = vpop.eup %2323  ;;  %v1526_v37 = vsel %vm1427_vm1, %v2322_v43, 0.0 }
 0x19d   : > { %v2326_v51 = vpop.eup %2325  ;;  %v1525_v56 = vadd.f32 %v1524_v45, %v1523_v21  ;;  %v1506_v60 = vsel %vm1427_vm1, %v2324_v1, 0.0 }
 0x19e   : > { %v2328_v33 = vpop.eup %2327  ;;  %v1507_v41 = vsel %vm1427_vm1, %v2326_v51, 0.0 }
 0x19f   : > { %v2330_v63 = vpop.eup %2329  ;;  %v1527_v53 = vadd.f32 %v1526_v37, %v1525_v56  ;;  %v1508_v15 = vadd.f32 %v1507_v41, %v1506_v60  ;;  %v1530_v39 = vsel %vm1427_vm1, %v2328_v33, 0.0 }
 0x1a0   : > { %v2332_v20 = vpop.eup %2331  ;;  %v1511_v47 = vsel %vm1427_vm1, %v2330_v63, 0.0 }
 0x1a1   : > { %v2334_v27 = vpop.eup %2333  ;;  %v1529_v29 = vadd.f32 %v1528_v24, %v1527_v53  ;;  %v1510_v35 = vadd.f32 %v1509_v25, %v1508_v15  ;;  %v1532_v26 = vsel %vm1427_vm1, %v2332_v20, 0.0 }
 0x1a2   : > { %v2336_v38 = vpop.eup %2335  ;;  %v1513_v3 = vsel %vm1427_vm1, %v2334_v27, 0.0 }
 0x1a3   : > { %v2338_v48 = vpop.eup %2337  ;;  %v1531_v61 = vadd.f32 %v1530_v39, %v1529_v29  ;;  %v1512_v11 = vadd.f32 %v1511_v47, %v1510_v35  ;;  %v1534_v0 = vsel %vm1427_vm1, %v2336_v38, 0.0 }
 0x1a4   : > { %v2340_v14 = vpop.eup %2339  ;;  %v1515_v32 = vsel %vm1427_vm1, %v2338_v48, 0.0 }
 0x1a5   : > { %v1533_v58 = vadd.f32 %v1532_v26, %v1531_v61  ;;  %v1514_v31 = vadd.f32 %v1513_v3, %v1512_v11  ;;  %v2342_v52 = vpop.eup %2341  ;;  %v1517_v16 = vsel %vm1427_vm1, %v2340_v14, 0.0 }
 0x1a6   : > { %v1519_v42 = vsel %vm1427_vm1, %v2342_v52, 0.0 }
 0x1a7   : > { %v1535_v17 = vadd.f32 %v1534_v0, %v1533_v58  ;;  %v1516_v6 = vadd.f32 %v1515_v32, %v1514_v31 }
 0x1a9   : > { %2343 = vrcp.f32 %v1535_v17  ;;  %v1518_v10 = vadd.f32 %v1517_v16, %v1516_v6 }
 0x1ab   : > { %v1520_v4 = vadd.f32 %v1519_v42, %v1518_v10 }
 0x1ad   : > { %2345 = vrcp.f32 %v1520_v4 }
 0x1b3   : > { %v2344_v44 = vpop.eup %2343 }
 0x1b4   : > { %v1541_v34 = vmul.f32 %v2344_v44, %v2318_v55  ;;  %v1539_v23 = vmul.f32 %v2344_v44, %v2316_v46  ;;  %v1543_v54 = vmul.f32 %v2344_v44, %v2320_v5  ;;  %v1545_v2 = vmul.f32 %v2344_v44, %v2322_v43 }
 0x1b5   : > { %v1547_v57 = vmul.f32 %v2344_v44, %v2312_v22  ;;  %v1549_v30 = vmul.f32 %v2344_v44, %v2328_v33  ;;  %v1551_v9 = vmul.f32 %v2344_v44, %v2332_v20  ;;  %v1553_v21 = vmul.f32 %v2344_v44, %v2336_v38  ;;  %v3137_v44 = vld [vmem:[#allocation10_spill] sm:$0xff] }
 0x1b6   : > { %1571 = vperm.xlu1 %2310, %v1541_v34   ;;  %1561 = vperm.xlu0 %2309, %v1539_v23  }
 0x1b7   : > { %v2346_v45 = vpop.eup %2345 }
 0x1b8   : > { %v1537_v56 = vmul.f32 %v2346_v45, %v2324_v1  ;;  %v1542_v60 = vmul.f32 %v2346_v45, %v3007_v28  ;;  %v1544_v37 = vmul.f32 %v2346_v45, %v2330_v63  ;;  %v1540_v41 = vmul.f32 %v2346_v45, %v2326_v51 }
 0x1b9   : > { %v1546_v53 = vmul.f32 %v2346_v45, %v2334_v27  ;;  %v1548_v15 = vmul.f32 %v2346_v45, %v2338_v48  ;;  %v1550_v24 = vmul.f32 %v2346_v45, %v2340_v14  ;;  %v1552_v25 = vmul.f32 %v2346_v45, %v2342_v52  ;;  %v3136_v52 = vld [vmem:[#allocation9_spill] sm:$0xff] }
 0x1ba   : > { %1581 = vperm.xlu1 %2310, %v1543_v54   ;;  %1556 = vperm.xlu0 %2309, %v1537_v56  }
 0x1be   : > { %1591 = vperm.xlu1 %2310, %v1545_v2   ;;  %1576 = vperm.xlu0 %2309, %v1542_v60   ;;  %v3138_v60 = vld [vmem:[#allocation12_spill] sm:$0xff] }
 0x1c2   : > { %1601 = vperm.xlu1 %2310, %v1547_v57   ;;  %1586 = vperm.xlu0 %2309, %v1544_v37   ;;  %v3139_v37 = vld [vmem:[#allocation11_spill] sm:$0xff] }
 0x1c6   : > { %1566 = vperm.xlu1 %2310, %v1540_v41   ;;  %1596 = vperm.xlu0 %2309, %v1546_v53  }
 0x1ca   : > { %1611 = vperm.xlu1 %2310, %v1549_v30   ;;  %1606 = vperm.xlu0 %2309, %v1548_v15  }
 0x1ce   : > { %1621 = vperm.xlu1 %2310, %v1551_v9   ;;  %1616 = vperm.xlu0 %2309, %v1550_v24  }
 0x1d2   : > { %1631 = vperm.xlu1 %2310, %v1553_v21   ;;  %1626 = vperm.xlu0 %2309, %v1552_v25  }
 0x235   : > { %v1572_v22 = vpop.permute.xlu1 %1571  ;;  %v1562_v28 = vpop.permute.xlu0 %1561 }
 0x236   : > { %v1637_v1 = vmul.f32 %v1572_v22, %v2645_v13  ;;  %v1635_v63 = vmul.f32 %v1562_v28, %v2634_v8 }
 0x238   : > { %v1666_v29 = vsel %vm230_vm0, %v1637_v1, 0.0  ;;  %v1665_v39 = vsel %vm230_vm0, %v1635_v63, 0.0 }
 0x239   : > { %v1582_v46 = vpop.permute.xlu1 %1581  ;;  %v1557_v55 = vpop.permute.xlu0 %1556  ;;  %v1667_v26 = vadd.f32 %v1666_v29, %v1665_v39 }
 0x23a   : > { %v1639_v20 = vmul.f32 %v1582_v46, %v2659_v19  ;;  %v1634_v27 = vmul.f32 %v1557_v55, %v2631_v7 }
 0x23c   : > { %v1668_v61 = vsel %vm230_vm0, %v1639_v20, 0.0  ;;  %v1650_v8 = vsel %vm230_vm0, %v1634_v27, 0.0 }
 0x23d   : > { %v1592_v5 = vpop.permute.xlu1 %1591  ;;  %v1577_v43 = vpop.permute.xlu0 %1576  ;;  %v1669_v0 = vadd.f32 %v1668_v61, %v1667_v26 }
 0x23e   : > { %v1641_v47 = vmul.f32 %v1592_v5, %v2722_v49  ;;  %v1638_v48 = vmul.f32 %v1577_v43, %v2656_v18 }
 0x240   : > { %v1670_v49 = vsel %vm230_vm0, %v1641_v47, 0.0  ;;  %v1653_v18 = vsel %vm230_vm0, %v1638_v48, 0.0 }
 0x241   : > { %v1602_v51 = vpop.permute.xlu1 %1601  ;;  %v1587_v33 = vpop.permute.xlu0 %1586  ;;  %v1671_v6 = vadd.f32 %v1670_v49, %v1669_v0 }
 0x242   : > { %v1643_v19 = vmul.f32 %v1602_v51, %v2736_v59  ;;  %v1640_v7 = vmul.f32 %v1587_v33, %v2708_v40 }
 0x244   : > { %v1672_v59 = vsel %vm230_vm0, %v1643_v19, 0.0  ;;  %v1655_v40 = vsel %vm230_vm0, %v1640_v7, 0.0 }
 0x245   : > { %v1567_v35 = vpop.permute.xlu1 %1566  ;;  %v1597_v38 = vpop.permute.xlu0 %1596  ;;  %v1673_v23 = vadd.f32 %v1672_v59, %v1671_v6 }
 0x246   : > { %v1636_v13 = vmul.f32 %v1567_v35, %v2642_v12  ;;  %v1642_v12 = vmul.f32 %v1597_v38, %v2725_v50 }
 0x248   : > { %v1651_v11 = vsel %vm230_vm0, %v1636_v13, 0.0  ;;  %v1657_v4 = vsel %vm230_vm0, %v1642_v12, 0.0 }
 0x249   : > { %v1652_v3 = vadd.f32 %v1651_v11, %v1650_v8  ;;  %v1612_v14 = vpop.permute.xlu1 %1611  ;;  %v1607_v58 = vpop.permute.xlu0 %1606 }
 0x24a   : > { %v1645_v31 = vmul.f32 %v1612_v14, %v2780_v36  ;;  %v1644_v17 = vmul.f32 %v1607_v58, %v3136_v52 }
 0x24b   : > { %v1654_v32 = vadd.f32 %v1653_v18, %v1652_v3 }
 0x24c   : > { %v1674_v50 = vsel %vm230_vm0, %v1645_v31, 0.0  ;;  %v1659_v2 = vsel %vm230_vm0, %v1644_v17, 0.0 }
 0x24d   : > { %v1656_v16 = vadd.f32 %v1655_v40, %v1654_v32  ;;  %v1622_v10 = vpop.permute.xlu1 %1621  ;;  %v1617_v42 = vpop.permute.xlu0 %1616  ;;  %v1675_v30 = vadd.f32 %v1674_v50, %v1673_v23 }
 0x24e   : > { %v1647_v36 = vmul.f32 %v1622_v10, %v2804_v62  ;;  %v1646_v34 = vmul.f32 %v1617_v42, %v3137_v44 }
 0x24f   : > { %v1658_v54 = vadd.f32 %v1657_v4, %v1656_v16 }
 0x250   : > { %v1676_v57 = vsel %vm230_vm0, %v1647_v36, 0.0  ;;  %v1661_v56 = vsel %vm230_vm0, %v1646_v34, 0.0 }
 0x251   : > { %v1660_v9 = vadd.f32 %v1659_v2, %v1658_v54  ;;  %v1632_v21 = vpop.permute.xlu1 %1631  ;;  %v1627_v45 = vpop.permute.xlu0 %1626  ;;  %v1677_v53 = vadd.f32 %v1676_v57, %v1675_v30 }
 0x252   : > { %v1649_v62 = vmul.f32 %v1632_v21, %v3138_v60  ;;  %v1648_v41 = vmul.f32 %v1627_v45, %v3139_v37 }
 0x253   : > { %v1662_v15 = vadd.f32 %v1661_v56, %v1660_v9 }
 0x254   : > { %v1678_v24 = vsel %vm230_vm0, %v1649_v62, 0.0  ;;  %v1663_v25 = vsel %vm230_vm0, %v1648_v41, 0.0 }
 0x255   : > { %v1679_v22 = vadd.f32 %v1678_v24, %v1677_v53  ;;  %v1664_v28 = vadd.f32 %v1663_v25, %v1662_v15 }
 0x257   : > { %1681 = vst.msk [vmem:[%s207_s4 + $0x8] sm:$0xff] %vm230_vm0, %v1679_v22  ;;  %1680 = vst.msk [vmem:[%s207_s4] sm:$0xff] %vm230_vm0, %v1664_v28 }
 0x258   : > { %2390 = shalt.err (!%p2387_p5)
}
 0x259   : > { %s2391_s11 = scalar_lea.hbm %s3064_s17, 256  ;;  %s2395_s25 = scalar_lea.hbm %s3120_s3, 512 }
 0x25a   : > { %p2392_p4 = scmp.ne.s32.totalorder %s3064_s17, %s2391_s11  ;;  %p2396_p12 = scmp.lt.u32.totalorder %s3064_s17, %s3120_s3 }
 0x25b   : > { %p2397_p1 = scmp.lt.u32.totalorder %s2395_s25, %s2391_s11  ;;  %p2399_p8 = scmp.lt.u32.totalorder %s2391_s11, %s3064_s17 }
 0x25c   : > { %p2393_p7 = pnand %p2392_p4, %p3140_p9 }
 0x25d   : > { %p2398_p3 = por %p2397_p1, %p2396_p12 }
 0x25e   : > { %p2394_p10 = pneg %p2393_p7 }
 0x25f   : > { %p2400_p11 = por %p2399_p8, %p2398_p3 }
 0x261   : > { %p2401_p0 = pnand %p2400_p11, %p2394_p10 }
 0x263   : > { %2404 = shalt.err (!%p2401_p0)
}
 0x264   : > { %s2466_s29 = smov 128   ;;  %s2467_s30 = smov 8  }
 0x265   : > { %2244 = dma.vmem_to_hbm [thread:$0]  (%p3140_p9), %s3066_s5, 256, %s3064_s17, %s1683_s13, %s2466_s29, %s2466_s29, %s2467_s30  }
 0x266 PF: > { %s1713_s4 = sand.u32 1, %s2439_s14   ;;  %p3141_p6 = scmp.ne.s32.totalorder %s3129_s28, 0 }
 0x267   : > { %p3142_p13 = scmp.ge.s32.totalorder %s2459_s19, 2  ;;  %s1714_s6 = scalar_lea.sflag [#allocation5], %s1713_s4 }
 0x269   : > { %p2251_p2 = pnand %p3142_p13, %p3141_p6 }
 0x26b   : > { %2434 = dma.done.wait (!%p2251_p2), %s1714_s6, 256  }
 0x26c   : > { %2436 = vsyncadd (!%p2251_p2), %s1714_s6, 4294967040  ;;  %s20_s19 = sadd.s32 1, %s2459_s19   ;;  %s3143_s14 = smov %s2443_s15 }
 0x26d   : > { %p17_p5 = scmp.ge.s32.totalorder %s20_s19, 4   ;;  %s3144_s15 = smov %s2447_s16 }
 0x26e   : > { %s3145_s16 = smov %s2547_s27  ;;  %s3146_s17 = smov %s2455_s18 }
 0x26f   : > { %s3147_s18 = smov %s3149_s21  ;;  %19 = sbr.rel (!%p17_p5) target bundleno = 8 (0x8), region = 77 }
 0x276   :  { %1719 = vsyncpa [#allocation4], 1 }
 0x277   :  { %1721 = vsyncpa [#allocation4 + $0x1], 1 }
 0x278   :  { %1722 = vsyncpa [#allocation5], 1 }
 0x279   :  { %1724 = vsyncpa [#allocation5 + $0x1], 1 }

</bundles_post_ra>
